<compile_context>
chip_gen: v6e
topology: v6e:2x2x1
jax: 0.10.0
libtpu: 0.0.40
codegen_flags: <defaults>
</compile_context>

<pallas_src>
import functools

import jax
import jax.numpy as jnp
from jax.experimental import pallas as pl
from jax.experimental.pallas import tpu as pltpu

IN_H = 56
IN_W = 28
IN_FEATURES = IN_H * IN_W     # 1568
OUT_FEATURES = 19
OUT_PAD = 128                 # lane-dense output width
TILE_B = 1024                 # max batch rows per grid step


def _round_up(n, m):
    return ((n + m - 1) // m) * m


def _linear_relu_kernel(x_ref, w_ref, b_ref, o_ref):
    # x_ref: (tb, 1568)  w_ref: (1568, 128)  b_ref: (1, 128)  o_ref: (tb, 128)
    y = jnp.dot(x_ref[...], w_ref[...], preferred_element_type=jnp.float32)
    y = y + b_ref[...]                                 # bias broadcast over batch
    o_ref[...] = jnp.maximum(y, 0.0).astype(o_ref.dtype)


def prepare_params(weight, bias):
    """One-time prep: pad 19->128 output features and pre-transpose W.

    weight: (19, 1568) -> (1568, 128) zero-padded transpose
    bias:   (19,)      -> (1, 128)    zero-padded
    """
    w_padT = (jnp.zeros((IN_FEATURES, OUT_PAD), weight.dtype)
              .at[:, :OUT_FEATURES].set(weight.T))
    b_pad = (jnp.zeros((1, OUT_PAD), bias.dtype)
             .at[0, :OUT_FEATURES].set(bias))
    return w_padT, b_pad


@functools.partial(jax.jit, static_argnames=("tile_b",))
def linear_classifier56_forward(x, w_padT, b_pad, *, tile_b=TILE_B):
    """x: (B, 56, 28); w_padT: (1568, 128); b_pad: (1, 128) -> (B, 19)."""
    B = x.shape[0]
    x_flat = x.reshape(B, IN_FEATURES)                 # nn.Flatten()

    # Sublane multiple depends on dtype (8 for f32, 16 for bf16).
    sub = 16 if x.dtype == jnp.bfloat16 else 8
    # Cap the tile at ceil(B/2) (rounded to sublanes) so the grid has >= 2
    # steps whenever B allows it -> both v7x TensorCores are used.
    tb = min(tile_b, _round_up(pl.cdiv(max(B, 1), 2), sub))
    tb = max(tb, sub)

    grid = (pl.cdiv(B, tb),)                           # ragged last block OK

    cost = pl.CostEstimate(
        flops=2 * B * IN_FEATURES * OUT_PAD,
        transcendentals=0,
        bytes_accessed=x_flat.dtype.itemsize * B * IN_FEATURES
                       + 4 * (IN_FEATURES * OUT_PAD + OUT_PAD)
                       + x.dtype.itemsize * B * OUT_PAD,
    )

    out = pl.pallas_call(
        _linear_relu_kernel,
        out_shape=jax.ShapeDtypeStruct((B, OUT_PAD), x.dtype),
        grid=grid,
        in_specs=[
            pl.BlockSpec((tb, IN_FEATURES), lambda i: (i, 0)),          # x: streamed
            pl.BlockSpec((IN_FEATURES, OUT_PAD), lambda i: (0, 0)),     # W: resident
            pl.BlockSpec((1, OUT_PAD), lambda i: (0, 0)),               # b: resident
        ],
        out_specs=pl.BlockSpec((tb, OUT_PAD), lambda i: (i, 0)),
        compiler_params=pltpu.CompilerParams(
            dimension_semantics=("parallel",),      # shard batch tiles across TCs
            vmem_limit_bytes=48 * 1024 * 1024,      # fits v5e/v6e (128 MiB) & v7x (64 MiB)
        ),
        cost_estimate=cost,
    )(x_flat, w_padT, b_pad)

    # Only the cheap column slice remains (rows already exactly B).
    return out[:, :OUT_FEATURES]


def init_params(key):
    """Deterministic init mirroring nn.Linear's U(-1/sqrt(fan_in), 1/sqrt(fan_in))."""
    k_w, k_b = jax.random.split(key)
    bound = 1.0 / jnp.sqrt(jnp.float32(IN_FEATURES))
    weight = jax.random.uniform(
        k_w, (OUT_FEATURES, IN_FEATURES), jnp.float32, minval=-bound, maxval=bound)
    bias = jax.random.uniform(
        k_b, (OUT_FEATURES,), jnp.float32, minval=-bound, maxval=bound)
    return weight, bias


if __name__ == "__main__":
    key = jax.random.PRNGKey(0)
    k_x, k_p = jax.random.split(key)

    B = 2
    x = jax.random.normal(k_x, (B, IN_H, IN_W), jnp.float32)
    weight, bias = init_params(k_p)

    # Hoisted, one-time weight/bias prep (padded + transposed).
    w_padT, b_pad = prepare_params(weight, bias)

    out = linear_classifier56_forward(x, w_padT, b_pad)
    out = jax.block_until_ready(out)

    # Reference check in plain JAX (same math as the PyTorch module).
    ref = jnp.maximum(x.reshape(B, -1) @ weight.T + bias, 0.0)
    assert out.shape == (B, OUT_FEATURES)
    assert jnp.allclose(out, ref, atol=1e-5, rtol=1e-5)

    print("KERNEL_OK")
</pallas_src>

<mosaic_0001>
module attributes {stable_mosaic.version = 11 : i64} {
  func.func @_linear_relu_kernel(%arg0: i32, %arg1: memref<8x1568xf32, #tpu.memory_space<vmem>>, %arg2: memref<1568x128xf32, #tpu.memory_space<vmem>>, %arg3: memref<1x128xf32, #tpu.memory_space<vmem>>, %arg4: memref<8x128xf32, #tpu.memory_space<vmem>>) attributes {dimension_semantics = [#tpu.dimension_semantics<parallel>], iteration_bounds = array<i64: 1>, scalar_prefetch = 0 : i64, scratch_operands = 0 : i64, tpu.core_type = #tpu.core_type<tc>, window_params = [{transform_indices = @transform_0, window_bounds = array<i64: 8, 1568>}, {pipeline_mode = #tpu.pipeline_mode<synchronous>, transform_indices = @transform_1, window_bounds = array<i64: 1568, 128>}, {pipeline_mode = #tpu.pipeline_mode<synchronous>, transform_indices = @transform_2, window_bounds = array<i64: 1, 128>}, {transform_indices = @transform_3, window_bounds = array<i64: 8, 128>}]} {
    %c0 = arith.constant 0 : index
    %c0_0 = arith.constant 0 : index
    %0 = vector.load %arg1[%c0, %c0_0] : memref<8x1568xf32, #tpu.memory_space<vmem>>, vector<8x1568xf32>
    %c0_1 = arith.constant 0 : index
    %c0_2 = arith.constant 0 : index
    %1 = vector.load %arg2[%c0_1, %c0_2] : memref<1568x128xf32, #tpu.memory_space<vmem>>, vector<1568x128xf32>
    %cst = arith.constant dense<0.000000e+00> : vector<8x128xf32>
    %2 = tpu.matmul %0, %1, %cst {dimension_numbers = #tpu.dot_dimension_numbers<[1], [0], [0], [1], [0, 0, 1, 1], [], []>} : vector<8x1568xf32>, vector<1568x128xf32>, vector<8x128xf32> -> vector<8x128xf32>
    %c0_3 = arith.constant 0 : index
    %c0_4 = arith.constant 0 : index
    %3 = vector.load %arg3[%c0_3, %c0_4] : memref<1x128xf32, #tpu.memory_space<vmem>>, vector<1x128xf32>
    %4 = vector.broadcast %3 : vector<1x128xf32> to vector<8x128xf32>
    %5 = arith.addf %2, %4 : vector<8x128xf32>
    %cst_5 = arith.constant 0.000000e+00 : f32
    %6 = vector.broadcast %cst_5 : f32 to vector<8x128xf32>
    %7 = arith.maximumf %5, %6 : vector<8x128xf32>
    %c0_6 = arith.constant 0 : index
    %c0_7 = arith.constant 0 : index
    %8 = vector.load %arg4[%c0_6, %c0_7] : memref<8x128xf32, #tpu.memory_space<vmem>>, vector<8x128xf32>
    tpu.vector_store %arg4[%c0_6, %c0_7], %7 {strides = array<i32>} : memref<8x128xf32, #tpu.memory_space<vmem>>, vector<8x128xf32>,
    return
  }
  func.func @transform_0(%arg0: i32) -> (i32, i32) {
    %c0_i32 = arith.constant 0 : i32
    %c0_i32_0 = arith.constant 0 : i32
    return %arg0, %c0_i32 : i32, i32
  }
  func.func @transform_1(%arg0: i32) -> (i32, i32) {
    %c0_i32 = arith.constant 0 : i32
    %c0_i32_0 = arith.constant 0 : i32
    %c0_i32_1 = arith.constant 0 : i32
    return %c0_i32, %c0_i32_0 : i32, i32
  }
  func.func @transform_2(%arg0: i32) -> (i32, i32) {
    %c0_i32 = arith.constant 0 : i32
    %c0_i32_0 = arith.constant 0 : i32
    %c0_i32_1 = arith.constant 0 : i32
    return %c0_i32, %c0_i32_0 : i32, i32
  }
  func.func @transform_3(%arg0: i32) -> (i32, i32) {
    %c0_i32 = arith.constant 0 : i32
    %c0_i32_0 = arith.constant 0 : i32
    return %arg0, %c0_i32 : i32, i32
  }
}

</mosaic_0001>

<bundles_post_ra>
// kernel: linear_classifier56_forward.1
= control target key start
LH: loop header
LB: loop body
LE: loop exit
PB: predicated region body
PF: predicated region fallthrough
CT: control target
= control target key end

     0   :  { %8 = vsyncpa [#allocation3], 0  ;;  %s1310_s0 = inlined_call_operand.vmem [shape: f32[2,1568], index: 0, kind: input, shape index: {}]   ;;  %s1311_s1 = inlined_call_operand.hbm [shape: f32[1568,128], index: 1, kind: input, shape index: {}]   ;;  %s1312_s2 = inlined_call_operand.vmem [shape: f32[1,128], index: 2, kind: input, shape index: {}]   ;;  %s1313_s3 = inlined_call_operand.hbm [shape: f32[2,128], index: 3, kind: output, shape index: {}]  }
   0x1   :  { %9 = vsyncpa [#allocation4], 0  ;;  %s1214_s12 = smov [#allocation2]  }
   0x2   :  { %s17_s13 = sshll.u32 %s1214_s12, 4  ;;  %s18_s13 = int_to_ptr.vmem [resolvable:$true] %s17_s13 }
   0x3   :  { %s1178_s14 = scalar_lea.vmem %s18_s13, 25088  ;;  %p1183_p1 = scmp.lt.s32.totalorder %s18_s13, %s18_s13 }
   0x4   :  { %p1179_p0 = scmp.ne.s32.totalorder %s18_s13, %s1178_s14  ;;  %p1184_p2 = scmp.lt.s32.totalorder %s1178_s14, %s1178_s14 }
   0x6   :  { %p1185_p3 = por %p1184_p2, %p1183_p1 }
   0x8   :  { %p1186_p4 = pnand %p1185_p3, %p1179_p0 }
   0xa   :  { %1189 = shalt.err (!%p1186_p4)
}
   0xb   :  { %s1215_s15 = smov 128   ;;  %s1216_s16 = smov 8  }
   0xc   :  { %23 = dma.hbm_to_vmem [thread:$0]  %s1311_s1, 25088, %s18_s13, [#allocation3], %s1215_s15, %s1215_s15, %s1216_s16  }
   0xd   :  { %1210 = dma.done.wait [#allocation3], 25088  }
   0xe   :  { %1211 = vsyncadd [#allocation3], 4294942208  ;;  %v76_v0 = vld [vmem:[#allocation2 + $0xf8] sm:$0xff]  ;;  %v75_v4 = vld [vmem:[#allocation2 + $0xf0] sm:$0xff]  ;;  %v1217_v30 = vmov 1983009808   ;;  %v271_v32 = vlaneseq }
   0xf   :  { %v108_v1 = vld [vmem:[#allocation2 + $0x1f8] sm:$0xff]  ;;  %915 = vmatprep.subr.mxu0 %v76_v0  ;;  %v107_v5 = vld [vmem:[#allocation2 + $0x1f0] sm:$0xff]  ;;  %v74_v8 = vld [vmem:[#allocation2 + $0xe8] sm:$0xff]  ;;  %v269_v31 = vunpack.c.l.s4 %v1217_v30  ;;  %vm1219_vm0 = vmmov 0   ;;  %vm401_vm1 = vcmask 261120  }
  0x10   :  { %v60_v2 = vld [vmem:[#allocation2 + $0x78] sm:$0xff]  ;;  %950 = vmatprep.subr.mxu1 %v108_v1  ;;  %v59_v6 = vld [vmem:[#allocation2 + $0x70] sm:$0xff]  ;;  %v106_v9 = vld [vmem:[#allocation2 + $0x1e8] sm:$0xff]  ;;  %v272_v42 = vshrl.u32 %v271_v32, 7 }
  0x11   :  { %v92_v3 = vld [vmem:[#allocation2 + $0x178] sm:$0xff]  ;;  %916 = vmatpush3.msra.mxu0 %v60_v2  ;;  %v91_v7 = vld [vmem:[#allocation2 + $0x170] sm:$0xff]  ;;  %v58_v10 = vld [vmem:[#allocation2 + $0x68] sm:$0xff]  ;;  %v270_v41 = vunpack.c.0.s8 %v269_v31 }
  0x12   :  { %951 = vmatpush3.msra.mxu1 %v92_v3  ;;  %917 = vmatprep.subr.mxu0 %v75_v4  ;;  %v90_v11 = vld [vmem:[#allocation2 + $0x168] sm:$0xff]  ;;  %v73_v12 = vld [vmem:[#allocation2 + $0xe0] sm:$0xff]  ;;  %v72_v16 = vld [vmem:[#allocation2 + $0xd8] sm:$0xff] }
  0x13   :  { %952 = vmatprep.subr.mxu1 %v107_v5  ;;  %918 = vmatpush3.msra.mxu0 %v59_v6  ;;  %v105_v13 = vld [vmem:[#allocation2 + $0x1e0] sm:$0xff]  ;;  %v104_v17 = vld [vmem:[#allocation2 + $0x1d8] sm:$0xff]  ;;  %v71_v20 = vld [vmem:[#allocation2 + $0xd0] sm:$0xff]  ;;  %v1246_v55 = vsub.s32 %v270_v41, %v272_v42 }
  0x14   :  { %953 = vmatpush3.msra.mxu1 %v91_v7  ;;  %919 = vmatprep.subr.mxu0 %v74_v8  ;;  %v57_v14 = vld [vmem:[#allocation2 + $0x60] sm:$0xff]  ;;  %v56_v18 = vld [vmem:[#allocation2 + $0x58] sm:$0xff]  ;;  %v103_v21 = vld [vmem:[#allocation2 + $0x1d0] sm:$0xff] }
  0x15   :  { %954 = vmatprep.subr.mxu1 %v106_v9  ;;  %v89_v15 = vld [vmem:[#allocation2 + $0x160] sm:$0xff]  ;;  %920 = vmatpush3.msra.mxu0 %v58_v10  ;;  %v88_v19 = vld [vmem:[#allocation2 + $0x158] sm:$0xff]  ;;  %v55_v22 = vld [vmem:[#allocation2 + $0x50] sm:$0xff] }
  0x16   :  { %955 = vmatpush3.msra.mxu1 %v90_v11  ;;  %921 = vmatprep.subr.mxu0 %v73_v12  ;;  %v87_v23 = vld [vmem:[#allocation2 + $0x150] sm:$0xff]  ;;  %v70_v24 = vld [vmem:[#allocation2 + $0xc8] sm:$0xff]  ;;  %v69_v28 = vld [vmem:[#allocation2 + $0xc0] sm:$0xff] }
  0x17   :  { %956 = vmatprep.subr.mxu1 %v105_v13  ;;  %922 = vmatpush3.msra.mxu0 %v57_v14  ;;  %v102_v25 = vld [vmem:[#allocation2 + $0x1c8] sm:$0xff]  ;;  %v101_v29 = vld [vmem:[#allocation2 + $0x1c0] sm:$0xff]  ;;  %v68_v35 = vld [vmem:[#allocation2 + $0xb8] sm:$0xff] }
  0x18   :  { %957 = vmatpush3.msra.mxu1 %v89_v15  ;;  %923 = vmatprep.subr.mxu0 %v72_v16  ;;  %v54_v26 = vld [vmem:[#allocation2 + $0x48] sm:$0xff]  ;;  %v53_v33 = vld [vmem:[#allocation2 + $0x40] sm:$0xff]  ;;  %v100_v36 = vld [vmem:[#allocation2 + $0x1b8] sm:$0xff] }
  0x19   :  { %958 = vmatprep.subr.mxu1 %v104_v17  ;;  %924 = vmatpush3.msra.mxu0 %v56_v18  ;;  %v86_v27 = vld [vmem:[#allocation2 + $0x148] sm:$0xff]  ;;  %v85_v34 = vld [vmem:[#allocation2 + $0x140] sm:$0xff]  ;;  %v52_v37 = vld [vmem:[#allocation2 + $0x38] sm:$0xff] }
  0x1a   :  { %959 = vmatpush3.msra.mxu1 %v88_v19  ;;  %925 = vmatprep.subr.mxu0 %v71_v20  ;;  %v84_v38 = vld [vmem:[#allocation2 + $0x138] sm:$0xff]  ;;  %v67_v39 = vld [vmem:[#allocation2 + $0xb0] sm:$0xff]  ;;  %v66_v45 = vld [vmem:[#allocation2 + $0xa8] sm:$0xff] }
  0x1b   :  { %960 = vmatprep.subr.mxu1 %v103_v21  ;;  %926 = vmatpush3.msra.mxu0 %v55_v22  ;;  %v99_v40 = vld [vmem:[#allocation2 + $0x1b0] sm:$0xff]  ;;  %v98_v46 = vld [vmem:[#allocation2 + $0x1a8] sm:$0xff]  ;;  %v65_v49 = vld [vmem:[#allocation2 + $0xa0] sm:$0xff] }
  0x1c   :  { %961 = vmatpush3.msra.mxu1 %v87_v23  ;;  %927 = vmatprep.subr.mxu0 %v70_v24  ;;  %v51_v43 = vld [vmem:[#allocation2 + $0x30] sm:$0xff]  ;;  %v50_v47 = vld [vmem:[#allocation2 + $0x28] sm:$0xff]  ;;  %v97_v50 = vld [vmem:[#allocation2 + $0x1a0] sm:$0xff] }
  0x1d   :  { %962 = vmatprep.subr.mxu1 %v102_v25  ;;  %928 = vmatpush3.msra.mxu0 %v54_v26  ;;  %v83_v44 = vld [vmem:[#allocation2 + $0x130] sm:$0xff]  ;;  %v82_v48 = vld [vmem:[#allocation2 + $0x128] sm:$0xff]  ;;  %v49_v51 = vld [vmem:[#allocation2 + $0x20] sm:$0xff] }
  0x1e   :  { %963 = vmatpush3.msra.mxu1 %v86_v27  ;;  %929 = vmatprep.subr.mxu0 %v69_v28  ;;  %v81_v52 = vld [vmem:[#allocation2 + $0x120] sm:$0xff]  ;;  %v64_v53 = vld [vmem:[#allocation2 + $0x98] sm:$0xff]  ;;  %v1152_v58 = vld [vmem:[%s1310_s0 + $0x34] ss:$26 sps:$4 sm:$0xff]  }
  0x1f   :  { %964 = vmatprep.subr.mxu1 %v101_v29  ;;  %930 = vmatpush3.msra.mxu0 %v53_v33  ;;  %v96_v54 = vld [vmem:[#allocation2 + $0x198] sm:$0xff]  ;;  %v63_v62 = vld [vmem:[#allocation2 + $0x90] sm:$0xff]  ;;  %v288_v1 = vrot.slane %v1152_v58, %v1246_v55  ;;  %v62_v4 = vld [vmem:[#allocation2 + $0x88] sm:$0xff] }
  0x20   :  { %965 = vmatpush3.msra.mxu1 %v85_v34  ;;  %931 = vmatprep.subr.mxu0 %v68_v35  ;;  %v48_v56 = vld [vmem:[#allocation2 + $0x18] sm:$0xff]  ;;  %v95_v63 = vld [vmem:[#allocation2 + $0x190] sm:$0xff]  ;;  %v94_v5 = vld [vmem:[#allocation2 + $0x188] sm:$0xff] }
  0x21   :  { %966 = vmatprep.subr.mxu1 %v100_v36  ;;  %932 = vmatpush3.msra.mxu0 %v52_v37  ;;  %v1150_v57 = vld [vmem:[%s1310_s0] ss:$26 sps:$4 sm:$0xff]   ;;  %v47_v2 = vld [vmem:[#allocation2 + $0x10] sm:$0xff]  ;;  %v46_v8 = vld [vmem:[#allocation2 + $0x8] sm:$0xff] }
  0x22   :  { %967 = vmatpush3.msra.mxu1 %v84_v38  ;;  %933 = vmatprep.subr.mxu0 %v67_v39  ;;  %v80_v59 = vld [vmem:[#allocation2 + $0x118] sm:$0xff]  ;;  %v274_v0 = vrot.slane %v1150_v57, %v1246_v55  ;;  %v79_v3 = vld [vmem:[#allocation2 + $0x110] sm:$0xff]  ;;  %v78_v9 = vld [vmem:[#allocation2 + $0x108] sm:$0xff] }
  0x23   :  { %968 = vmatprep.subr.mxu1 %v99_v40  ;;  %934 = vmatpush3.msra.mxu0 %v51_v43  ;;  %v1154_v60 = vld [vmem:[%s1310_s0 + $0x4] ss:$26 sps:$4 sm:$0xff]   ;;  %v1155_v61 = vld [vmem:[%s1310_s0 + $0x38] ss:$26 sps:$4 sm:$0xff]   ;;  %v138_v26 = vld [vmem:[#allocation2 + $0x2e8] sm:$0xff] }
  0x24   :  { %969 = vmatpush3.msra.mxu1 %v83_v44  ;;  %935 = vmatprep.subr.mxu0 %v66_v45  ;;  %v281_v6 = vrot.slane %v1154_v60, %v1246_v55  ;;  %v295_v7 = vrot.slane %v1155_v61, %v1246_v55  ;;  %v61_v10 = vld [vmem:[#allocation2 + $0x80] sm:$0xff]  ;;  %v297_v12 = vcombine.high %v274_v0, %v288_v1  ;;  %v140_v17 = vld [vmem:[#allocation2 + $0x2f8] sm:$0xff]  ;;  %v139_v22 = vld [vmem:[#allocation2 + $0x2f0] sm:$0xff] }
  0x25   :  { %970 = vmatprep.subr.mxu1 %v98_v46  ;;  %936 = vmatpush3.msra.mxu0 %v50_v47  ;;  %v93_v11 = vld [vmem:[#allocation2 + $0x180] sm:$0xff]  ;;  %v296_v14 = vcombine.low %v274_v0, %v288_v1  ;;  %v172_v19 = vld [vmem:[#allocation2 + $0x3f8] sm:$0xff]  ;;  %v171_v23 = vld [vmem:[#allocation2 + $0x3f0] sm:$0xff] }
  0x26   :  { %971 = vmatpush3.msra.mxu1 %v82_v48  ;;  %937 = vmatprep.subr.mxu0 %v65_v49  ;;  %v45_v13 = vld [vmem:[#allocation2] sm:$0xff]  ;;  %v299_v16 = vcombine.high %v281_v6, %v295_v7  ;;  %v298_v18 = vcombine.low %v281_v6, %v295_v7  ;;  %v124_v20 = vld [vmem:[#allocation2 + $0x278] sm:$0xff]  ;;  %v123_v24 = vld [vmem:[#allocation2 + $0x270] sm:$0xff] }
  0x27   :  { %972 = vmatprep.subr.mxu1 %v97_v50  ;;  %938 = vmatpush3.msra.mxu0 %v49_v51  ;;  %v77_v15 = vld [vmem:[#allocation2 + $0x100] sm:$0xff]  ;;  %v156_v21 = vld [vmem:[#allocation2 + $0x378] sm:$0xff]  ;;  %v155_v25 = vld [vmem:[#allocation2 + $0x370] sm:$0xff] }
  0x28   :  { %973 = vmatpush3.msra.mxu1 %v81_v52  ;;  %939 = vmatprep.subr.mxu0 %v64_v53  ;;  %v170_v27 = vld [vmem:[#allocation2 + $0x3e8] sm:$0xff]  ;;  %v137_v30 = vld [vmem:[#allocation2 + $0x2e0] sm:$0xff]  ;;  %v136_v34 = vld [vmem:[#allocation2 + $0x2d8] sm:$0xff] }
  0x29   :  { %974 = vmatprep.subr.mxu1 %v96_v54  ;;  %940 = vmatpush3.msra.mxu0 %v48_v56  ;;  %v122_v28 = vld [vmem:[#allocation2 + $0x268] sm:$0xff]  ;;  %v169_v31 = vld [vmem:[#allocation2 + $0x3e0] sm:$0xff]  ;;  %v168_v35 = vld [vmem:[#allocation2 + $0x3d8] sm:$0xff] }
  0x2a   :  { %975 = vmatpush3.msra.mxu1 %v80_v59  ;;  %941 = vmatprep.subr.mxu0 %v63_v62  ;;  %v154_v29 = vld [vmem:[#allocation2 + $0x368] sm:$0xff]  ;;  %v121_v32 = vld [vmem:[#allocation2 + $0x260] sm:$0xff]  ;;  %v120_v36 = vld [vmem:[#allocation2 + $0x258] sm:$0xff] }
  0x2b   :  { %976 = vmatprep.subr.mxu1 %v95_v63  ;;  %942 = vmatpush3.msra.mxu0 %v47_v2  ;;  %v153_v33 = vld [vmem:[#allocation2 + $0x360] sm:$0xff]  ;;  %v152_v37 = vld [vmem:[#allocation2 + $0x358] sm:$0xff]  ;;  %v135_v38 = vld [vmem:[#allocation2 + $0x2d0] sm:$0xff] }
  0x2c   :  { %977 = vmatpush3.msra.mxu1 %v79_v3  ;;  %943 = vmatprep.subr.mxu0 %v62_v4  ;;  %v167_v39 = vld [vmem:[#allocation2 + $0x3d0] sm:$0xff]  ;;  %v134_v42 = vld [vmem:[#allocation2 + $0x2c8] sm:$0xff]  ;;  %v133_v46 = vld [vmem:[#allocation2 + $0x2c0] sm:$0xff] }
  0x2d   :  { %978 = vmatprep.subr.mxu1 %v94_v5  ;;  %944 = vmatpush3.msra.mxu0 %v46_v8  ;;  %v119_v40 = vld [vmem:[#allocation2 + $0x250] sm:$0xff]  ;;  %v166_v43 = vld [vmem:[#allocation2 + $0x3c8] sm:$0xff]  ;;  %v165_v47 = vld [vmem:[#allocation2 + $0x3c0] sm:$0xff] }
  0x2e   :  { %979 = vmatpush3.msra.mxu1 %v78_v9  ;;  %945 = vmatprep.subr.mxu0 %v61_v10  ;;  %v151_v41 = vld [vmem:[#allocation2 + $0x350] sm:$0xff]  ;;  %v118_v44 = vld [vmem:[#allocation2 + $0x248] sm:$0xff]  ;;  %v117_v48 = vld [vmem:[#allocation2 + $0x240] sm:$0xff] }
  0x2f   :  { %980 = vmatprep.subr.mxu1 %v93_v11  ;;  %946 = vmatpush3.msra.mxu0 %v45_v13  ;;  %v150_v45 = vld [vmem:[#allocation2 + $0x348] sm:$0xff]  ;;  %v149_v49 = vld [vmem:[#allocation2 + $0x340] sm:$0xff]  ;;  %v132_v50 = vld [vmem:[#allocation2 + $0x2b8] sm:$0xff] }
  0x30   :  { %468 = vmatprep.mubr.f32.mxu0 %v297_v12  ;;  %981 = vmatpush3.msra.mxu1 %v77_v15  ;;  %v164_v51 = vld [vmem:[#allocation2 + $0x3b8] sm:$0xff]  ;;  %v131_v54 = vld [vmem:[#allocation2 + $0x2b0] sm:$0xff]  ;;  %v130_v59 = vld [vmem:[#allocation2 + $0x2a8] sm:$0xff] }
  0x31   :  { %469 = vmatmul.mubr.f32.vlgmr.msra.gmra.mxu0 %v296_v14  ;;  %538 = vmatprep.mubr.f32.mxu1 %v299_v16  ;;  %v116_v52 = vld [vmem:[#allocation2 + $0x238] sm:$0xff]  ;;  %v163_v56 = vld [vmem:[#allocation2 + $0x3b0] sm:$0xff]  ;;  %v162_v60 = vld [vmem:[#allocation2 + $0x3a8] sm:$0xff] }
  0x32   :  { %985 = vmatprep.subr.mxu0 %v140_v17  ;;  %1020 = vmatprep.subr.mxu1 %v172_v19  ;;  %v148_v53 = vld [vmem:[#allocation2 + $0x338] sm:$0xff]  ;;  %v115_v57 = vld [vmem:[#allocation2 + $0x230] sm:$0xff]  ;;  %v114_v61 = vld [vmem:[#allocation2 + $0x228] sm:$0xff] }
  0x33   :  { %539 = vmatmul.mubr.f32.vlgmr.msra.gmra.mxu1 %v298_v18  ;;  %986 = vmatpush3.msra.mxu0 %v124_v20  ;;  %v147_v58 = vld [vmem:[#allocation2 + $0x330] sm:$0xff]  ;;  %v146_v62 = vld [vmem:[#allocation2 + $0x328] sm:$0xff]  ;;  %v129_v63 = vld [vmem:[#allocation2 + $0x2a0] sm:$0xff] }
  0x34   :  { %1021 = vmatpush3.msra.mxu1 %v156_v21  ;;  %987 = vmatprep.subr.mxu0 %v139_v22  ;;  %v161_v0 = vld [vmem:[#allocation2 + $0x3a0] sm:$0xff]  ;;  %v1158_v2 = vld [vmem:[%s1310_s0 + $0x3c] ss:$26 sps:$4 sm:$0xff]   ;;  %v126_v17 = vld [vmem:[#allocation2 + $0x288] sm:$0xff] }
  0x35   :  { %1022 = vmatprep.subr.mxu1 %v171_v23  ;;  %988 = vmatpush3.msra.mxu0 %v123_v24  ;;  %v1156_v1 = vld [vmem:[%s1310_s0 + $0x8] ss:$26 sps:$4 sm:$0xff]   ;;  %v128_v5 = vld [vmem:[#allocation2 + $0x298] sm:$0xff]  ;;  %v127_v11 = vld [vmem:[#allocation2 + $0x290] sm:$0xff]  ;;  %v324_v14 = vrot.slane %v1158_v2, %v1246_v55 }
  0x36   :  { %1023 = vmatpush3.msra.mxu1 %v155_v25  ;;  %989 = vmatprep.subr.mxu0 %v138_v26  ;;  %v113_v3 = vld [vmem:[#allocation2 + $0x220] sm:$0xff]  ;;  %v160_v6 = vld [vmem:[#allocation2 + $0x398] sm:$0xff]  ;;  %v159_v12 = vld [vmem:[#allocation2 + $0x390] sm:$0xff]  ;;  %v310_v13 = vrot.slane %v1156_v1, %v1246_v55 }
  0x37   :  { %1024 = vmatprep.subr.mxu1 %v170_v27  ;;  %990 = vmatpush3.msra.mxu0 %v122_v28  ;;  %v145_v4 = vld [vmem:[#allocation2 + $0x320] sm:$0xff]  ;;  %v112_v9 = vld [vmem:[#allocation2 + $0x218] sm:$0xff]  ;;  %v111_v15 = vld [vmem:[#allocation2 + $0x210] sm:$0xff] }
  0x38   :  { %1025 = vmatpush3.msra.mxu1 %v154_v29  ;;  %991 = vmatprep.subr.mxu0 %v137_v30  ;;  %v1160_v7 = vld [vmem:[%s1310_s0 + $0xc] ss:$26 sps:$4 sm:$0xff]   ;;  %v1161_v8 = vld [vmem:[%s1310_s0 + $0x40] ss:$26 sps:$4 sm:$0xff]   ;;  %v143_v16 = vld [vmem:[#allocation2 + $0x310] sm:$0xff]  ;;  %v333_v25 = vcombine.high %v310_v13, %v324_v14  ;;  %v332_v27 = vcombine.low %v310_v13, %v324_v14 }
  0x39   :  { %1026 = vmatprep.subr.mxu1 %v169_v31  ;;  %992 = vmatpush3.msra.mxu0 %v121_v32  ;;  %v144_v10 = vld [vmem:[#allocation2 + $0x318] sm:$0xff]  ;;  %v158_v18 = vld [vmem:[#allocation2 + $0x388] sm:$0xff]  ;;  %v317_v19 = vrot.slane %v1160_v7, %v1246_v55  ;;  %v331_v20 = vrot.slane %v1161_v8, %v1246_v55  ;;  %v125_v23 = vld [vmem:[#allocation2 + $0x280] sm:$0xff] }
  0x3a   :  { %1027 = vmatpush3.msra.mxu1 %v153_v33  ;;  %993 = vmatprep.subr.mxu0 %v136_v34  ;;  %v110_v21 = vld [vmem:[#allocation2 + $0x208] sm:$0xff]  ;;  %v157_v24 = vld [vmem:[#allocation2 + $0x380] sm:$0xff]  ;;  %v204_v30 = vld [vmem:[#allocation2 + $0x4f8] sm:$0xff] }
  0x3b   :  { %1028 = vmatprep.subr.mxu1 %v168_v35  ;;  %994 = vmatpush3.msra.mxu0 %v120_v36  ;;  %v142_v22 = vld [vmem:[#allocation2 + $0x308] sm:$0xff]  ;;  %v109_v26 = vld [vmem:[#allocation2 + $0x200] sm:$0xff]  ;;  %v335_v29 = vcombine.high %v317_v19, %v331_v20  ;;  %v334_v31 = vcombine.low %v317_v19, %v331_v20  ;;  %v236_v32 = vld [vmem:[#allocation2 + $0x5f8] sm:$0xff] }
  0x3c   :  { %1029 = vmatpush3.msra.mxu1 %v152_v37  ;;  %995 = vmatprep.subr.mxu0 %v135_v38  ;;  %v141_v28 = vld [vmem:[#allocation2 + $0x300] sm:$0xff]  ;;  %v188_v33 = vld [vmem:[#allocation2 + $0x478] sm:$0xff]  ;;  %v203_v35 = vld [vmem:[#allocation2 + $0x4f0] sm:$0xff] }
  0x3d   :  { %1030 = vmatprep.subr.mxu1 %v167_v39  ;;  %996 = vmatpush3.msra.mxu0 %v119_v40  ;;  %v220_v34 = vld [vmem:[#allocation2 + $0x578] sm:$0xff]  ;;  %v235_v36 = vld [vmem:[#allocation2 + $0x5f0] sm:$0xff]  ;;  %v202_v39 = vld [vmem:[#allocation2 + $0x4e8] sm:$0xff] }
  0x3e   :  { %1031 = vmatpush3.msra.mxu1 %v151_v41  ;;  %997 = vmatprep.subr.mxu0 %v134_v42  ;;  %v187_v37 = vld [vmem:[#allocation2 + $0x470] sm:$0xff]  ;;  %v234_v40 = vld [vmem:[#allocation2 + $0x5e8] sm:$0xff]  ;;  %v228_v1 = vld [vmem:[#allocation2 + $0x5b8] sm:$0xff] }
  0x3f   :  { %1032 = vmatprep.subr.mxu1 %v166_v43  ;;  %998 = vmatpush3.msra.mxu0 %v118_v44  ;;  %v219_v38 = vld [vmem:[#allocation2 + $0x570] sm:$0xff]  ;;  %v186_v41 = vld [vmem:[#allocation2 + $0x468] sm:$0xff]  ;;  %v201_v43 = vld [vmem:[#allocation2 + $0x4e0] sm:$0xff] }
  0x40   :  { %1033 = vmatpush3.msra.mxu1 %v150_v45  ;;  %999 = vmatprep.subr.mxu0 %v133_v46  ;;  %v218_v42 = vld [vmem:[#allocation2 + $0x568] sm:$0xff]  ;;  %v233_v44 = vld [vmem:[#allocation2 + $0x5e0] sm:$0xff]  ;;  %v180_v2 = vld [vmem:[#allocation2 + $0x438] sm:$0xff] }
  0x41   :  { %1034 = vmatprep.subr.mxu1 %v165_v47  ;;  %1000 = vmatpush3.msra.mxu0 %v117_v48  ;;  %v185_v45 = vld [vmem:[#allocation2 + $0x460] sm:$0xff]  ;;  %v200_v47 = vld [vmem:[#allocation2 + $0x4d8] sm:$0xff]  ;;  %v211_v7 = vld [vmem:[#allocation2 + $0x530] sm:$0xff] }
  0x42   :  { %1035 = vmatpush3.msra.mxu1 %v149_v49  ;;  %1001 = vmatprep.subr.mxu0 %v132_v50  ;;  %v217_v46 = vld [vmem:[#allocation2 + $0x560] sm:$0xff]  ;;  %v232_v48 = vld [vmem:[#allocation2 + $0x5d8] sm:$0xff]  ;;  %v194_v8 = vld [vmem:[#allocation2 + $0x4a8] sm:$0xff] }
  0x43   :  { %1036 = vmatprep.subr.mxu1 %v164_v51  ;;  %1002 = vmatpush3.msra.mxu0 %v116_v52  ;;  %v184_v49 = vld [vmem:[#allocation2 + $0x458] sm:$0xff]  ;;  %v199_v51 = vld [vmem:[#allocation2 + $0x4d0] sm:$0xff]  ;;  %v225_v13 = vld [vmem:[#allocation2 + $0x5a0] sm:$0xff] }
  0x44   :  { %1037 = vmatpush3.msra.mxu1 %v148_v53  ;;  %1003 = vmatprep.subr.mxu0 %v131_v54  ;;  %v216_v50 = vld [vmem:[#allocation2 + $0x558] sm:$0xff]  ;;  %v231_v52 = vld [vmem:[#allocation2 + $0x5d0] sm:$0xff]  ;;  %v177_v14 = vld [vmem:[#allocation2 + $0x420] sm:$0xff] }
  0x45   :  { %1038 = vmatprep.subr.mxu1 %v163_v56  ;;  %1004 = vmatpush3.msra.mxu0 %v115_v57  ;;  %v183_v53 = vld [vmem:[#allocation2 + $0x450] sm:$0xff]  ;;  %v198_v56 = vld [vmem:[#allocation2 + $0x4c8] sm:$0xff]  ;;  %v192_v20 = vld [vmem:[#allocation2 + $0x498] sm:$0xff] }
  0x46   :  { %1039 = vmatpush3.msra.mxu1 %v147_v58  ;;  %1005 = vmatprep.subr.mxu0 %v130_v59  ;;  %v215_v54 = vld [vmem:[#allocation2 + $0x550] sm:$0xff]  ;;  %v230_v57 = vld [vmem:[#allocation2 + $0x5c8] sm:$0xff] }
  0x47   :  { %1040 = vmatprep.subr.mxu1 %v162_v60  ;;  %1006 = vmatpush3.msra.mxu0 %v114_v61  ;;  %v182_v58 = vld [vmem:[#allocation2 + $0x448] sm:$0xff]  ;;  %v197_v60 = vld [vmem:[#allocation2 + $0x4c0] sm:$0xff] }
  0x48   :  { %1041 = vmatpush3.msra.mxu1 %v146_v62  ;;  %1007 = vmatprep.subr.mxu0 %v129_v63  ;;  %v214_v59 = vld [vmem:[#allocation2 + $0x548] sm:$0xff]  ;;  %v229_v61 = vld [vmem:[#allocation2 + $0x5c0] sm:$0xff] }
  0x49   :  { %1042 = vmatprep.subr.mxu1 %v161_v0  ;;  %1008 = vmatpush3.msra.mxu0 %v113_v3  ;;  %v181_v62 = vld [vmem:[#allocation2 + $0x440] sm:$0xff]  ;;  %v196_v0 = vld [vmem:[#allocation2 + $0x4b8] sm:$0xff] }
  0x4a   :  { %1043 = vmatpush3.msra.mxu1 %v145_v4  ;;  %1009 = vmatprep.subr.mxu0 %v128_v5  ;;  %v213_v63 = vld [vmem:[#allocation2 + $0x540] sm:$0xff]  ;;  %v212_v3 = vld [vmem:[#allocation2 + $0x538] sm:$0xff]  ;;  %v195_v4 = vld [vmem:[#allocation2 + $0x4b0] sm:$0xff] }
  0x4b   :  { %1044 = vmatprep.subr.mxu1 %v160_v6  ;;  %1010 = vmatpush3.msra.mxu0 %v112_v9  ;;  %v227_v5 = vld [vmem:[#allocation2 + $0x5b0] sm:$0xff]  ;;  %v226_v9 = vld [vmem:[#allocation2 + $0x5a8] sm:$0xff] }
  0x4c   :  { %1045 = vmatpush3.msra.mxu1 %v144_v10  ;;  %1011 = vmatprep.subr.mxu0 %v127_v11  ;;  %v179_v6 = vld [vmem:[#allocation2 + $0x430] sm:$0xff]  ;;  %v178_v10 = vld [vmem:[#allocation2 + $0x428] sm:$0xff] }
  0x4d   :  { %1046 = vmatprep.subr.mxu1 %v159_v12  ;;  %1012 = vmatpush3.msra.mxu0 %v111_v15  ;;  %v210_v11 = vld [vmem:[#allocation2 + $0x528] sm:$0xff]  ;;  %v193_v12 = vld [vmem:[#allocation2 + $0x4a0] sm:$0xff] }
  0x4e   :  { %1047 = vmatpush3.msra.mxu1 %v143_v16  ;;  %1013 = vmatprep.subr.mxu0 %v126_v17  ;;  %v1162_v15 = vld [vmem:[%s1310_s0 + $0x10] ss:$26 sps:$4 sm:$0xff]   ;;  %v1164_v16 = vld [vmem:[%s1310_s0 + $0x44] ss:$26 sps:$4 sm:$0xff]  }
  0x4f   :  { %1048 = vmatprep.subr.mxu1 %v158_v18  ;;  %1014 = vmatpush3.msra.mxu0 %v110_v21  ;;  %v209_v17 = vld [vmem:[#allocation2 + $0x520] sm:$0xff]  ;;  %v1166_v18 = vld [vmem:[%s1310_s0 + $0x14] ss:$26 sps:$4 sm:$0xff]   ;;  %v224_v21 = vld [vmem:[#allocation2 + $0x598] sm:$0xff] }
  0x50   :  { %1049 = vmatpush3.msra.mxu1 %v142_v22  ;;  %1015 = vmatprep.subr.mxu0 %v125_v23  ;;  %v1167_v19 = vld [vmem:[%s1310_s0 + $0x48] ss:$26 sps:$4 sm:$0xff]   ;;  %v176_v22 = vld [vmem:[#allocation2 + $0x418] sm:$0xff] }
  0x51   :  { %1050 = vmatprep.subr.mxu1 %v157_v24  ;;  %1016 = vmatpush3.msra.mxu0 %v109_v26  ;;  %v208_v23 = vld [vmem:[#allocation2 + $0x518] sm:$0xff]  ;;  %v191_v24 = vld [vmem:[#allocation2 + $0x490] sm:$0xff]  ;;  %v346_v26 = vrot.slane %v1162_v15, %v1246_v55 }
  0x52   :  { %608 = vmatprep.mubr.f32.mxu0 %v333_v25  ;;  %1051 = vmatpush3.msra.mxu1 %v141_v28  ;;  %v223_v25 = vld [vmem:[#allocation2 + $0x590] sm:$0xff] }
  0x53   :  { %609 = vmatmul.mubr.f32.vlgmr.msra.gmra.mxu0 %v332_v27  ;;  %678 = vmatprep.mubr.f32.mxu1 %v335_v29  ;;  %v360_v27 = vrot.slane %v1164_v16, %v1246_v55  ;;  %v175_v28 = vld [vmem:[#allocation2 + $0x410] sm:$0xff] }
  0x54   :  { %1055 = vmatprep.subr.mxu0 %v204_v30  ;;  %1090 = vmatprep.subr.mxu1 %v236_v32  ;;  %v207_v29 = vld [vmem:[#allocation2 + $0x510] sm:$0xff]  ;;  %v353_v30 = vrot.slane %v1166_v18, %v1246_v55  ;;  %v190_v32 = vld [vmem:[#allocation2 + $0x488] sm:$0xff] }
  0x55   :  { %679 = vmatmul.mubr.f32.vlgmr.msra.gmra.mxu1 %v334_v31  ;;  %1056 = vmatpush3.msra.mxu0 %v188_v33  ;;  %v367_v31 = vrot.slane %v1167_v19, %v1246_v55  ;;  %v222_v33 = vld [vmem:[#allocation2 + $0x588] sm:$0xff] }
  0x56   :  { %1091 = vmatpush3.msra.mxu1 %v220_v34  ;;  %1057 = vmatprep.subr.mxu0 %v203_v35  ;;  %v174_v34 = vld [vmem:[#allocation2 + $0x408] sm:$0xff] }
  0x57   :  { %1092 = vmatprep.subr.mxu1 %v235_v36  ;;  %1058 = vmatpush3.msra.mxu0 %v187_v37  ;;  %v206_v35 = vld [vmem:[#allocation2 + $0x508] sm:$0xff]  ;;  %v189_v36 = vld [vmem:[#allocation2 + $0x480] sm:$0xff] }
  0x58   :  { %1093 = vmatpush3.msra.mxu1 %v219_v38  ;;  %1059 = vmatprep.subr.mxu0 %v202_v39  ;;  %v221_v37 = vld [vmem:[#allocation2 + $0x580] sm:$0xff]  ;;  %v369_v38 = vcombine.high %v346_v26, %v360_v27 }
  0x59   :  { %1094 = vmatprep.subr.mxu1 %v234_v40  ;;  %1060 = vmatpush3.msra.mxu0 %v186_v41  ;;  %v173_v39 = vld [vmem:[#allocation2 + $0x400] sm:$0xff]  ;;  %v371_v40 = vcombine.high %v353_v30, %v367_v31 }
  0x5a   :  { %1095 = vmatpush3.msra.mxu1 %v218_v42  ;;  %1061 = vmatprep.subr.mxu0 %v201_v43  ;;  %v205_v41 = vld [vmem:[#allocation2 + $0x500] sm:$0xff]  ;;  %v368_v42 = vcombine.low %v346_v26, %v360_v27  ;;  %v370_v43 = vcombine.low %v353_v30, %v367_v31 }
  0x5b   :  { %1096 = vmatprep.subr.mxu1 %v233_v44  ;;  %1062 = vmatpush3.msra.mxu0 %v185_v45  ;;  %v1168_v44 = vld [vmem:[%s1310_s0 + $0x18] ss:$26 sps:$4 sm:$0x33]   ;;  %v1169_v45 = vld [vmem:[%s1310_s0 + $0x4c] ss:$26 sps:$4 sm:$0x33]  }
  0x5c   :  { %1097 = vmatpush3.msra.mxu1 %v217_v46  ;;  %1063 = vmatprep.subr.mxu0 %v200_v47  ;;  %v240_v46 = vld [vmem:[#allocation2 + $0x618] sm:$0xff]  ;;  %v1218_v47 = vmov 0.0  }
  0x5d   :  { %1098 = vmatprep.subr.mxu1 %v232_v48  ;;  %1064 = vmatpush3.msra.mxu0 %v184_v49  ;;  %v239_v48 = vld [vmem:[#allocation2 + $0x610] sm:$0xff]  ;;  %v380_v49 = vrot.slane %v1168_v44, %v1246_v55 }
  0x5e   :  { %1099 = vmatpush3.msra.mxu1 %v216_v50  ;;  %1065 = vmatprep.subr.mxu0 %v199_v51  ;;  %v387_v50 = vrot.slane %v1169_v45, %v1246_v55  ;;  %v238_v51 = vld [vmem:[#allocation2 + $0x608] sm:$0xff]  ;;  %v913_v55 = vld [vmem:[%s1312_s2] ss:$0 sm:$0xff] }
  0x5f   :  { %1100 = vmatprep.subr.mxu1 %v231_v52  ;;  %1066 = vmatpush3.msra.mxu0 %v183_v53  ;;  %v237_v52 = vld [vmem:[#allocation2 + $0x600] sm:$0xff] }
  0x60   :  { %1101 = vmatpush3.msra.mxu1 %v215_v54  ;;  %1067 = vmatprep.subr.mxu0 %v198_v56  ;;  %v388_v53 = vcombine.low %v380_v49, %v387_v50 }
  0x61   :  { %1102 = vmatprep.subr.mxu1 %v230_v57  ;;  %1068 = vmatpush3.msra.mxu0 %v182_v58 }
  0x62   :  { %1103 = vmatpush3.msra.mxu1 %v214_v59  ;;  %1069 = vmatprep.subr.mxu0 %v197_v60 }
  0x63   :  { %1104 = vmatprep.subr.mxu1 %v229_v61  ;;  %1070 = vmatpush3.msra.mxu0 %v181_v62 }
  0x64   :  { %1105 = vmatpush3.msra.mxu1 %v213_v63  ;;  %1071 = vmatprep.subr.mxu0 %v196_v0 }
  0x65   :  { %1106 = vmatprep.subr.mxu1 %v228_v1  ;;  %1072 = vmatpush3.msra.mxu0 %v180_v2 }
  0x66   :  { %1107 = vmatpush3.msra.mxu1 %v212_v3  ;;  %1073 = vmatprep.subr.mxu0 %v195_v4 }
  0x67   :  { %1108 = vmatprep.subr.mxu1 %v227_v5  ;;  %1074 = vmatpush3.msra.mxu0 %v179_v6 }
  0x68   :  { %1109 = vmatpush3.msra.mxu1 %v211_v7  ;;  %1075 = vmatprep.subr.mxu0 %v194_v8 }
  0x69   :  { %1110 = vmatprep.subr.mxu1 %v226_v9  ;;  %1076 = vmatpush3.msra.mxu0 %v178_v10 }
  0x6a   :  { %1111 = vmatpush3.msra.mxu1 %v210_v11  ;;  %1077 = vmatprep.subr.mxu0 %v193_v12 }
  0x6b   :  { %1112 = vmatprep.subr.mxu1 %v225_v13  ;;  %1078 = vmatpush3.msra.mxu0 %v177_v14 }
  0x6c   :  { %1113 = vmatpush3.msra.mxu1 %v209_v17  ;;  %1079 = vmatprep.subr.mxu0 %v192_v20 }
  0x6d   :  { %1114 = vmatprep.subr.mxu1 %v224_v21  ;;  %1080 = vmatpush3.msra.mxu0 %v176_v22 }
  0x6e   :  { %1115 = vmatpush3.msra.mxu1 %v208_v23  ;;  %1081 = vmatprep.subr.mxu0 %v191_v24 }
  0x6f   :  { %1116 = vmatprep.subr.mxu1 %v223_v25  ;;  %1082 = vmatpush3.msra.mxu0 %v175_v28 }
  0x70   :  { %1117 = vmatpush3.msra.mxu1 %v207_v29  ;;  %1083 = vmatprep.subr.mxu0 %v190_v32 }
  0x71   :  { %1118 = vmatprep.subr.mxu1 %v222_v33  ;;  %1084 = vmatpush3.msra.mxu0 %v174_v34 }
  0x72   :  { %1119 = vmatpush3.msra.mxu1 %v206_v35  ;;  %1085 = vmatprep.subr.mxu0 %v189_v36 }
  0x73   :  { %1120 = vmatprep.subr.mxu1 %v221_v37  ;;  %1086 = vmatpush3.msra.mxu0 %v173_v39 }
  0x74   :  { %748 = vmatprep.mubr.f32.mxu0 %v369_v38  ;;  %1121 = vmatpush3.msra.mxu1 %v205_v41 }
  0x75   :  { %818 = vmatprep.mubr.f32.mxu1 %v371_v40  ;;  %749 = vmatmul.mubr.f32.vlgmr.msra.gmra.mxu0 %v368_v42 }
  0x76   :  { %819 = vmatmul.mubr.f32.vlgmr.msra.gmra.mxu1 %v370_v43  ;;  %1130 = vmatprep.subr.mxu0 %v1218_v47 }
  0x77   :  { %1138 = vmatprep.mubr.msk.f32.mxu0 %vm1219_vm0, %v1218_v47  ;;  %1131 = vmatpush3.msra.mxu0 %v240_v46 }
  0x78   :  { %1132 = vmatprep.subr.mxu0 %v1218_v47 }
  0x79   :  { %1133 = vmatpush3.msra.mxu0 %v239_v48 }
  0x7a   :  { %1134 = vmatprep.subr.mxu0 %v1218_v47 }
  0x7b   :  { %1135 = vmatpush3.msra.mxu0 %v238_v51 }
  0x7c   :  { %1136 = vmatprep.subr.mxu0 %v1218_v47 }
  0x7d   :  { %1137 = vmatpush3.msra.mxu0 %v237_v52 }
  0x7e   :  { %1139 = vmatmul.mubr.msk.f32.vlgmr.msra.gmra.mxu0 %vm401_vm1, %v388_v53 }
  0xf1   :  { %v947_v54 = vpop.f32.mrf.mxu0 }
  0xf3   :  { %v982_v56 = vpop.f32.mrf.mxu1  ;;  %v948_v57 = vpop.f32.mrf.mxu0 }
  0xf4   :  { %v949_v59 = vadd.f32 %v948_v57, %v947_v54 }
  0xf5   :  { %v983_v60 = vpop.f32.mrf.mxu1 }
  0xf6   :  { %v471_v63 = vadd.f32 %v949_v59, %v913_v55  ;;  %v984_v0 = vadd.f32 %v983_v60, %v982_v56 }
  0xf8   :  { %v541_v3 = vadd.f32 %v984_v0, %v471_v63 }
 0x113   :  { %v1017_v58 = vpop.f32.mrf.mxu0 }
 0x115   :  { %v1052_v61 = vpop.f32.mrf.mxu1  ;;  %v1018_v62 = vpop.f32.mrf.mxu0 }
 0x116   :  { %v1019_v1 = vadd.f32 %v1018_v62, %v1017_v58 }
 0x117   :  { %v1053_v2 = vpop.f32.mrf.mxu1 }
 0x118   :  { %v611_v4 = vadd.f32 %v1019_v1, %v541_v3  ;;  %v1054_v5 = vadd.f32 %v1053_v2, %v1052_v61 }
 0x11a   :  { %v681_v10 = vadd.f32 %v1054_v5, %v611_v4 }
 0x135   :  { %v1087_v6 = vpop.f32.mrf.mxu0 }
 0x136   :  { %v1122_v7 = vpop.f32.mrf.mxu1 }
 0x137   :  { %v1088_v8 = vpop.f32.mrf.mxu0 }
 0x138   :  { %v1123_v9 = vpop.f32.mrf.mxu1  ;;  %v1089_v11 = vadd.f32 %v1088_v8, %v1087_v6 }
 0x139   :  { %v1124_v13 = vadd.f32 %v1123_v9, %v1122_v7 }
 0x13a   :  { %v751_v12 = vadd.f32 %v1089_v11, %v681_v10 }
 0x13c   :  { %v821_v14 = vadd.f32 %v1124_v13, %v751_v12 }
 0x13e   :  { %v890_v15 = vpop.f32.mrf.mxu0 }
 0x13f   :  { %v891_v16 = vadd.f32 %v890_v15, %v821_v14 }
 0x140   :  { %v1140_v17 = vpop.f32.mrf.mxu0 }
 0x141   :  { %v894_v18 = vmax.f32 %v891_v16, 0.0 }
 0x143   :  { %895 = vst [vmem:[#allocation5] sm:$0xff] %v894_v18 }
 0x144   :  { %900 = vsyncadd [#allocation4], 96  ;;  %s1220_s2 = smov [#allocation5]  }
 0x145   :  { %s901_s19 = sshll.u32 %s1220_s2, 4  ;;  %s902_s19 = int_to_ptr.vmem [resolvable:$true] %s901_s19 }
 0x146   :  { %s1190_s20 = scalar_lea.vmem %s902_s19, 32  ;;  %s1194_s21 = scalar_lea.vmem %s902_s19, 128 }
 0x147   :  { %p1191_p5 = scmp.ne.s32.totalorder %s902_s19, %s1190_s20  ;;  %p1195_p6 = scmp.lt.s32.totalorder %s902_s19, %s902_s19 }
 0x148   :  { %p1196_p7 = scmp.lt.s32.totalorder %s1194_s21, %s1190_s20 }
 0x14a   :  { %p1197_p8 = por %p1196_p7, %p1195_p6 }
 0x14c   :  { %p1198_p9 = pnand %p1197_p8, %p1191_p5 }
 0x14e   :  { %1201 = shalt.err (!%p1198_p9)
}
 0x14f   :  { %s1221_s22 = smov 32   ;;  %s1222_s23 = smov 2  }
 0x150   :  { %907 = dma.vmem_to_hbm [thread:$0]  %s902_s19, 32, %s1313_s3, [#allocation4], %s1221_s22, %s1221_s22, %s1222_s23  }
 0x151   :  { %1212 = dma.done.wait [#allocation4], 128  }
 0x152   :  { %1213 = vsyncadd [#allocation4], 4294967168 }
 0x153   :  { %911 = vsyncpa [#allocation3], 1 }
 0x154   :  { %912 = vsyncpa [#allocation4], 1 }

</bundles_post_ra>
